<compile_context>
chip_gen: v6e
topology: v6e:2x2x1
jax: 0.10.0
libtpu: 0.0.40
codegen_flags: <defaults>
</compile_context>

<pallas_src>
import jax
import jax.numpy as jnp
from jax import lax
from jax.experimental import pallas as pl
from jax.experimental.pallas import tpu as pltpu

# ---- config mirroring NeuralNetwork.__init__ ----
NF = 2
DO_FDOTU = True
NX = NF * (1 + 2 * NF) + (2 * NF if DO_FDOTU else 0)   # = 14
NY = 8
NHIDDEN = 2
WIDTH = 32

TB = 256        # batch tile (lane axis of activations). Raise to 1024-4096 for large B.
BATCH = 512     # demo batch: 2 grid steps of TB=256 (even tile count -> both v7x TCs)


def mlp_kernel(*refs):
    """One batch tile, feature-major: h_(out, TB) = W_(out,in) @ h_(in, TB) + b_(out,1)."""
    x_ref = refs[0]
    o_ref = refs[-1]
    wb = refs[1:-1]                      # (w1, b1, w2, b2, w3, b3, w4, b4)
    n_layers = len(wb) // 2

    # x tile is (TB, NX) f32 in its natural layout; cast to bf16 for the MXU.
    xt = x_ref[...].astype(jnp.bfloat16)                      # (TB, NX)

    # Layer 1: W1 (WIDTH, NX) contracted with x (TB, NX) over NX -> (WIDTH, TB).
    # Transposed-RHS matmul (q @ k.T pattern): no explicit transpose of x needed.
    h = lax.dot_general(wb[0][...], xt,
                        dimension_numbers=(((1,), (1,)), ((), ())),
                        preferred_element_type=jnp.float32) + wb[1][...]

    for l in range(1, n_layers):
        h = jnp.maximum(h, 0.0).astype(jnp.bfloat16)          # ReLU f32 -> bf16 MXU feed
        h = jnp.dot(wb[2 * l][...], h,
                    preferred_element_type=jnp.float32) + wb[2 * l + 1][...]

    # Final layer output (NY, TB): lane-dense (TB multiple of 128), unpadded store.
    o_ref[...] = h.astype(o_ref.dtype)


def mlp_forward(x, weights, biases, tb=TB):
    """x: (B, NX) f32 -> (B, NY) f32. Batch-tiled grid, VMEM-resident weights."""
    B = x.shape[0]
    n_tiles = pl.cdiv(B, tb)
    Bp = n_tiles * tb
    xp = x if Bp == B else jnp.pad(x, ((0, Bp - B), (0, 0)))

    args = [xp]
    # x block: (TB, NX); last dim == full array dim (14), second-to-last divisible by 8.
    in_specs = [pl.BlockSpec((tb, NX), lambda i: (i, 0))]
    for w, b in zip(weights, biases):
        args.append(w)
        args.append(b)
        # Full-array blocks with constant index_map -> stay resident in VMEM across tiles.
        in_specs.append(pl.BlockSpec(w.shape, lambda i: (0, 0)))
        in_specs.append(pl.BlockSpec(b.shape, lambda i: (0, 0)))

    y_t = pl.pallas_call(
        mlp_kernel,
        out_shape=jax.ShapeDtypeStruct((NY, Bp), jnp.float32),
        grid=(n_tiles,),
        in_specs=in_specs,
        out_specs=pl.BlockSpec((NY, tb), lambda i: (0, i)),
        compiler_params=pltpu.CompilerParams(
            dimension_semantics=("parallel",),   # independent batch tiles (2 TCs on v7x)
        ),
    )(*args)

    y = y_t.T                                   # (Bp, NY): tiny 8-row transpose
    return y if Bp == B else y[:B]


def init_params(key):
    """Kaiming-normal weights (gain=sqrt(2), fan_in), zero biases — matches _init_weights.

    Weights use the PyTorch nn.Linear layout (out_dim, in_dim)."""
    dims = [NX] + [WIDTH] * (NHIDDEN + 1) + [NY]   # [14, 32, 32, 32, 8]
    weights, biases = [], []
    for i in range(len(dims) - 1):
        key, sub = jax.random.split(key)
        fan_in, fan_out = dims[i], dims[i + 1]
        std = (2.0 / fan_in) ** 0.5
        weights.append(std * jax.random.normal(sub, (fan_out, fan_in), dtype=jnp.float32))
        biases.append(jnp.zeros((fan_out,), dtype=jnp.float32))
    return weights, biases


def prep_params(weights, biases):
    """bf16 weights (MXU inputs) in (out, in) layout; f32 bias columns (out, 1)."""
    ws = [w.astype(jnp.bfloat16) for w in weights]
    bs = [b.reshape(-1, 1).astype(jnp.float32) for b in biases]
    return ws, bs


def reference_forward(x, ws, bs):
    """Pure-JAX reference mirroring the kernel's precision recipe (bf16 MXU in, f32 acc)."""
    h = x.astype(jnp.bfloat16).astype(jnp.float32)
    n = len(ws)
    for i, (w, b) in enumerate(zip(ws, bs)):
        wf = w.astype(jnp.float32)               # weights already bf16-rounded
        h = jnp.matmul(h, wf.T, precision=lax.Precision.HIGHEST) + b.reshape(1, -1)
        if i < n - 1:
            h = jnp.maximum(h, 0.0)
            h = h.astype(jnp.bfloat16).astype(jnp.float32)
    return h


if __name__ == "__main__":
    key = jax.random.PRNGKey(0)
    key, kx = jax.random.split(key)
    x = jax.random.normal(kx, (BATCH, NX), dtype=jnp.float32)

    weights, biases = init_params(key)
    ws, bs = prep_params(weights, biases)

    forward = jax.jit(mlp_forward)               # fuse pad / transpose plumbing with the call
    y = forward(x, ws, bs)
    y = jax.block_until_ready(y)

    y_ref = reference_forward(x, ws, bs)
    assert y.shape == (BATCH, NY), f"bad output shape {y.shape}"
    assert jnp.allclose(y, y_ref, atol=2e-3, rtol=2e-3), "mismatch vs reference"

    print("KERNEL_OK")
</pallas_src>

<mosaic_0001>
module attributes {stable_mosaic.version = 11 : i64} {
  func.func @mlp_kernel(%arg0: i32, %arg1: memref<256x14xf32, #tpu.memory_space<vmem>>, %arg2: memref<32x14xbf16, #tpu.memory_space<vmem>>, %arg3: memref<32x1xf32, #tpu.memory_space<vmem>>, %arg4: memref<32x32xbf16, #tpu.memory_space<vmem>>, %arg5: memref<32x1xf32, #tpu.memory_space<vmem>>, %arg6: memref<32x32xbf16, #tpu.memory_space<vmem>>, %arg7: memref<32x1xf32, #tpu.memory_space<vmem>>, %arg8: memref<8x32xbf16, #tpu.memory_space<vmem>>, %arg9: memref<8x1xf32, #tpu.memory_space<vmem>>, %arg10: memref<8x256xf32, #tpu.memory_space<vmem>>) attributes {dimension_semantics = [#tpu.dimension_semantics<parallel>], iteration_bounds = array<i64: 2>, scalar_prefetch = 0 : i64, scratch_operands = 0 : i64, tpu.core_type = #tpu.core_type<tc>, window_params = [{transform_indices = @transform_0, window_bounds = array<i64: 256, 14>}, {pipeline_mode = #tpu.pipeline_mode<synchronous>, transform_indices = @transform_1, window_bounds = array<i64: 32, 14>}, {pipeline_mode = #tpu.pipeline_mode<synchronous>, transform_indices = @transform_2, window_bounds = array<i64: 32, 1>}, {pipeline_mode = #tpu.pipeline_mode<synchronous>, transform_indices = @transform_3, window_bounds = array<i64: 32, 32>}, {pipeline_mode = #tpu.pipeline_mode<synchronous>, transform_indices = @transform_4, window_bounds = array<i64: 32, 1>}, {pipeline_mode = #tpu.pipeline_mode<synchronous>, transform_indices = @transform_5, window_bounds = array<i64: 32, 32>}, {pipeline_mode = #tpu.pipeline_mode<synchronous>, transform_indices = @transform_6, window_bounds = array<i64: 32, 1>}, {pipeline_mode = #tpu.pipeline_mode<synchronous>, transform_indices = @transform_7, window_bounds = array<i64: 8, 32>}, {pipeline_mode = #tpu.pipeline_mode<synchronous>, transform_indices = @transform_8, window_bounds = array<i64: 8, 1>}, {transform_indices = @transform_9, window_bounds = array<i64: 8, 256>}]} {
    %c0 = arith.constant 0 : index
    %c0_0 = arith.constant 0 : index
    %0 = vector.load %arg1[%c0, %c0_0] : memref<256x14xf32, #tpu.memory_space<vmem>>, vector<256x14xf32>
    %1 = arith.truncf %0 : vector<256x14xf32> to vector<256x14xbf16>
    %c0_1 = arith.constant 0 : index
    %c0_2 = arith.constant 0 : index
    %2 = vector.load %arg2[%c0_1, %c0_2] : memref<32x14xbf16, #tpu.memory_space<vmem>>, vector<32x14xbf16>
    %cst = arith.constant dense<0.000000e+00> : vector<32x256xf32>
    %3 = tpu.matmul %2, %1, %cst {dimension_numbers = #tpu.dot_dimension_numbers<[1], [1], [0], [0], [0, 0, 1, 0], [], []>} : vector<32x14xbf16>, vector<256x14xbf16>, vector<32x256xf32> -> vector<32x256xf32>
    %c0_3 = arith.constant 0 : index
    %c0_4 = arith.constant 0 : index
    %4 = vector.load %arg3[%c0_3, %c0_4] : memref<32x1xf32, #tpu.memory_space<vmem>>, vector<32x1xf32>
    %5 = vector.broadcast %4 : vector<32x1xf32> to vector<32x256xf32>
    %6 = arith.addf %3, %5 : vector<32x256xf32>
    %cst_5 = arith.constant 0.000000e+00 : f32
    %7 = vector.broadcast %cst_5 : f32 to vector<32x256xf32>
    %8 = arith.maximumf %6, %7 : vector<32x256xf32>
    %9 = arith.truncf %8 : vector<32x256xf32> to vector<32x256xbf16>
    %c0_6 = arith.constant 0 : index
    %c0_7 = arith.constant 0 : index
    %10 = vector.load %arg4[%c0_6, %c0_7] : memref<32x32xbf16, #tpu.memory_space<vmem>>, vector<32x32xbf16>
    %cst_8 = arith.constant dense<0.000000e+00> : vector<32x256xf32>
    %11 = tpu.matmul %10, %9, %cst_8 {dimension_numbers = #tpu.dot_dimension_numbers<[1], [0], [0], [1], [0, 0, 1, 1], [], []>} : vector<32x32xbf16>, vector<32x256xbf16>, vector<32x256xf32> -> vector<32x256xf32>
    %c0_9 = arith.constant 0 : index
    %c0_10 = arith.constant 0 : index
    %12 = vector.load %arg5[%c0_9, %c0_10] : memref<32x1xf32, #tpu.memory_space<vmem>>, vector<32x1xf32>
    %13 = vector.broadcast %12 : vector<32x1xf32> to vector<32x256xf32>
    %14 = arith.addf %11, %13 : vector<32x256xf32>
    %cst_11 = arith.constant 0.000000e+00 : f32
    %15 = vector.broadcast %cst_11 : f32 to vector<32x256xf32>
    %16 = arith.maximumf %14, %15 : vector<32x256xf32>
    %17 = arith.truncf %16 : vector<32x256xf32> to vector<32x256xbf16>
    %c0_12 = arith.constant 0 : index
    %c0_13 = arith.constant 0 : index
    %18 = vector.load %arg6[%c0_12, %c0_13] : memref<32x32xbf16, #tpu.memory_space<vmem>>, vector<32x32xbf16>
    %cst_14 = arith.constant dense<0.000000e+00> : vector<32x256xf32>
    %19 = tpu.matmul %18, %17, %cst_14 {dimension_numbers = #tpu.dot_dimension_numbers<[1], [0], [0], [1], [0, 0, 1, 1], [], []>} : vector<32x32xbf16>, vector<32x256xbf16>, vector<32x256xf32> -> vector<32x256xf32>
    %c0_15 = arith.constant 0 : index
    %c0_16 = arith.constant 0 : index
    %20 = vector.load %arg7[%c0_15, %c0_16] : memref<32x1xf32, #tpu.memory_space<vmem>>, vector<32x1xf32>
    %21 = vector.broadcast %20 : vector<32x1xf32> to vector<32x256xf32>
    %22 = arith.addf %19, %21 : vector<32x256xf32>
    %cst_17 = arith.constant 0.000000e+00 : f32
    %23 = vector.broadcast %cst_17 : f32 to vector<32x256xf32>
    %24 = arith.maximumf %22, %23 : vector<32x256xf32>
    %25 = arith.truncf %24 : vector<32x256xf32> to vector<32x256xbf16>
    %c0_18 = arith.constant 0 : index
    %c0_19 = arith.constant 0 : index
    %26 = vector.load %arg8[%c0_18, %c0_19] : memref<8x32xbf16, #tpu.memory_space<vmem>>, vector<8x32xbf16>
    %cst_20 = arith.constant dense<0.000000e+00> : vector<8x256xf32>
    %27 = tpu.matmul %26, %25, %cst_20 {dimension_numbers = #tpu.dot_dimension_numbers<[1], [0], [0], [1], [0, 0, 1, 1], [], []>} : vector<8x32xbf16>, vector<32x256xbf16>, vector<8x256xf32> -> vector<8x256xf32>
    %c0_21 = arith.constant 0 : index
    %c0_22 = arith.constant 0 : index
    %28 = vector.load %arg9[%c0_21, %c0_22] : memref<8x1xf32, #tpu.memory_space<vmem>>, vector<8x1xf32>
    %29 = vector.broadcast %28 : vector<8x1xf32> to vector<8x256xf32>
    %30 = arith.addf %27, %29 : vector<8x256xf32>
    %c0_23 = arith.constant 0 : index
    %c0_24 = arith.constant 0 : index
    %31 = vector.load %arg10[%c0_23, %c0_24] : memref<8x256xf32, #tpu.memory_space<vmem>>, vector<8x256xf32>
    tpu.vector_store %arg10[%c0_23, %c0_24], %30 {strides = array<i32>} : memref<8x256xf32, #tpu.memory_space<vmem>>, vector<8x256xf32>,
    return
  }
  func.func @transform_0(%arg0: i32) -> (i32, i32) {
    %c0_i32 = arith.constant 0 : i32
    %c0_i32_0 = arith.constant 0 : i32
    return %arg0, %c0_i32 : i32, i32
  }
  func.func @transform_1(%arg0: i32) -> (i32, i32) {
    %c0_i32 = arith.constant 0 : i32
    %c0_i32_0 = arith.constant 0 : i32
    %c0_i32_1 = arith.constant 0 : i32
    return %c0_i32, %c0_i32_0 : i32, i32
  }
  func.func @transform_2(%arg0: i32) -> (i32, i32) {
    %c0_i32 = arith.constant 0 : i32
    %c0_i32_0 = arith.constant 0 : i32
    %c0_i32_1 = arith.constant 0 : i32
    return %c0_i32, %c0_i32_0 : i32, i32
  }
  func.func @transform_3(%arg0: i32) -> (i32, i32) {
    %c0_i32 = arith.constant 0 : i32
    %c0_i32_0 = arith.constant 0 : i32
    %c0_i32_1 = arith.constant 0 : i32
    return %c0_i32, %c0_i32_0 : i32, i32
  }
  func.func @transform_4(%arg0: i32) -> (i32, i32) {
    %c0_i32 = arith.constant 0 : i32
    %c0_i32_0 = arith.constant 0 : i32
    %c0_i32_1 = arith.constant 0 : i32
    return %c0_i32, %c0_i32_0 : i32, i32
  }
  func.func @transform_5(%arg0: i32) -> (i32, i32) {
    %c0_i32 = arith.constant 0 : i32
    %c0_i32_0 = arith.constant 0 : i32
    %c0_i32_1 = arith.constant 0 : i32
    return %c0_i32, %c0_i32_0 : i32, i32
  }
  func.func @transform_6(%arg0: i32) -> (i32, i32) {
    %c0_i32 = arith.constant 0 : i32
    %c0_i32_0 = arith.constant 0 : i32
    %c0_i32_1 = arith.constant 0 : i32
    return %c0_i32, %c0_i32_0 : i32, i32
  }
  func.func @transform_7(%arg0: i32) -> (i32, i32) {
    %c0_i32 = arith.constant 0 : i32
    %c0_i32_0 = arith.constant 0 : i32
    %c0_i32_1 = arith.constant 0 : i32
    return %c0_i32, %c0_i32_0 : i32, i32
  }
  func.func @transform_8(%arg0: i32) -> (i32, i32) {
    %c0_i32 = arith.constant 0 : i32
    %c0_i32_0 = arith.constant 0 : i32
    %c0_i32_1 = arith.constant 0 : i32
    return %c0_i32, %c0_i32_0 : i32, i32
  }
  func.func @transform_9(%arg0: i32) -> (i32, i32) {
    %c0_i32 = arith.constant 0 : i32
    %c0_i32_0 = arith.constant 0 : i32
    return %c0_i32, %arg0 : i32, i32
  }
}

</mosaic_0001>

<bundles_post_ra>
// kernel: mlp_forward.1
= control target key start
LH: loop header
LB: loop body
LE: loop exit
PB: predicated region body
PF: predicated region fallthrough
CT: control target
= control target key end

     0   :  { %14 = vsyncpa [#allocation3], 0  ;;  %s1331_s0 = inlined_call_operand.vmem [shape: f32[512,14], index: 0, kind: input, shape index: {}]   ;;  %s1332_s1 = inlined_call_operand.vmem [shape: bf16[32,14], index: 1, kind: input, shape index: {}]   ;;  %s1333_s2 = inlined_call_operand.vmem [shape: f32[32,1], index: 2, kind: input, shape index: {}]   ;;  %s1334_s3 = inlined_call_operand.vmem [shape: bf16[32,32], index: 3, kind: input, shape index: {}]   ;;  %s1335_s4 = inlined_call_operand.vmem [shape: f32[32,1], index: 4, kind: input, shape index: {}]   ;;  %s1336_s5 = inlined_call_operand.vmem [shape: bf16[32,32], index: 5, kind: input, shape index: {}]   ;;  %s1337_s6 = inlined_call_operand.vmem [shape: f32[32,1], index: 6, kind: input, shape index: {}]   ;;  %s1338_s7 = inlined_call_operand.vmem [shape: bf16[8,32], index: 7, kind: input, shape index: {}]   ;;  %s1339_s8 = inlined_call_operand.vmem [shape: f32[8,1], index: 8, kind: input, shape index: {}]   ;;  %s1340_s9 = inlined_call_operand.hbm [shape: f32[8,512], index: 9, kind: output, shape index: {}]  }
   0x1   :  { %16 = vsyncpa [#allocation3 + $0x1], 0  ;;  %s1103_s30 = smov 0   ;;  %s1105_s10 = smov 0  }
   0x2   :  { %s1107_s11 = smov 0   ;;  %s1109_s12 = smov 0  }
   0x3 LB: > { %s1124_s13 = sadd.s32 4294967295, %s1049_s12   ;;  %s887_s14 = sadd.s32 4294967294, %s1049_s12   ;;  %s1049_s12 = sphi %s1109_s12, %s1346_s12   ;;  %s1045_s11 = sphi %s1107_s11, %s1345_s11   ;;  %s1041_s10 = sphi %s1105_s10, %s1344_s10   ;;  %s1037_s30 = sphi %s1103_s30, %s1343_s30  }
   0x4   : > { %s1128_s15 = sadd.s32 1, %s1049_s12   ;;  %s223_s16 = sadd.s32 1, %s1045_s11 }
   0x5   : > { %s220_s17 = ssub.s32 %s1049_s12, %s1128_s15  ;;  %p233_p0 = scmp.ne.s32.totalorder %s1045_s11, %s1041_s10 }
   0x6   : > { %p221_p1 = scmp.eq.s32.totalorder %s220_s17, 0  ;;  %p234_p2 = scmp.eq.s32.totalorder %s1124_s13, 1 }
   0x7   : > { %p239_p3 = scmp.ne.s32.totalorder %s1041_s10, %s1037_s30  ;;  %p240_p4 = scmp.eq.s32.totalorder %s887_s14, 1 }
   0x8   : > { %s1139_s18 = scalar_select %p221_p1, %s1045_s11, %s223_s16  }
   0x9   : > { %p1141_p5 = por %p234_p2, %p233_p0  ;;  %p1145_p6 = por %p240_p4, %p239_p3 }
   0xa   : > { %p890_p7 = scmp.ge.s32.totalorder %s1049_s12, 1  ;;  %p291_p8 = scmp.lt.s32.totalorder %s1049_s12, 3 }
   0xc   : > { %p292_p9 = pnand %p890_p7, %p291_p8 }
   0xd   : > { %s892_s21 = sshll.u32 (!%p292_p9), %s1124_s13, 5  ;;  %s324_s16 = sand.u32 (!%p292_p9), 1, %s1041_s10  }
   0xe   : > { %295 = sbr.rel (%p292_p9) target bundleno = 964 (0x3c4), region = 56  ;;  %p328_p10 = scmp.lt.s32.totalorder (!%p292_p9), %s892_s21, 63 }
   0xf   : > { %s891_s17 = sshll.u32 (!%p292_p9), %s324_s16, 4 }
  0x10   : > { %s326_s23 = scalar_lea.vmem (!%p292_p9), [#allocation2], %s891_s17 }
  0x11   : > { %s828_s24 = sshll.u32 (!%p292_p9), %s326_s23, 4  ;;  %s1292_s24 = int_to_ptr.vmem [resolvable:$true] %s828_s24 }
  0x12   : > { %s989_s27 = scalar_lea.vmem (!%p292_p9), %s1292_s24, 256 }
  0x13   : > { %v1155_v0 = vld [vmem:[%s1332_s1] sm:$0xff]   ;;  %vm421_vm0 = vcmask 113664   ;;  %v389_v1 = vld [vmem:[%s1333_s2 + $0x10] sm:$0xff]  ;;  %s1348_s21 = smov (!%p328_p10, %s892_s21), 63  ;;  %v1051_v2 = vmov 0   ;;  %v390_v4 = vld [vmem:[%s1333_s2 + $0x18] sm:$0xff]  ;;  %p990_p11 = scmp.ne.s32.totalorder %s1292_s24, %s989_s27 }
  0x14   : > { %929 = vmatprep.mubr.msk.bf16.mxu0 %vm421_vm0, %v1155_v0  ;;  %981 = vset.pattern.permute.xlu0 %v1051_v2  ;;  %v387_v3 = vld [vmem:[%s1333_s2] sm:$0xff]  ;;  %s893_s28 = sshll.u32 %s1348_s21, 3  ;;  %v388_v5 = vld [vmem:[%s1333_s2 + $0x8] sm:$0xff]  ;;  %v547_v15 = vld [vmem:[%s1335_s4 + $0x10] sm:$0xff]  ;;  %vm579_vm1 = vcmask 261120  }
  0x15   : > { %403 = vperm.xlu0 %981, %v389_v1   ;;  %982 = vset.pattern.permute.xlu1 %v1051_v2  ;;  %s1174_s22 = scalar_lea.vmem %s1331_s0, %s893_s28  ;;  %v548_v18 = vld [vmem:[%s1335_s4 + $0x18] sm:$0xff]  ;;  %v545_v21 = vld [vmem:[%s1335_s4] sm:$0xff]  ;;  %v546_v24 = vld [vmem:[%s1335_s4 + $0x8] sm:$0xff]  ;;  %p991_p12 = pnand %p990_p11, %p1141_p5 }
  0x16   : > { %393 = vperm.xlu1 %982, %v387_v3   ;;  %618 = vmatprep.mubr.bf16.mxu1 %v1051_v2  ;;  %v365_v6 = vld [vmem:[%s1174_s22 + $0xf0] sm:$0xff]  ;;  %v366_v7 = vld [vmem:[%s1174_s22 + $0xf8] sm:$0xff]  ;;  %v363_v11 = vld [vmem:[%s1174_s22 + $0xe0] sm:$0xff]  ;;  %s1052_s28 = smov [#allocation2]  }
  0x17   : > { %v349_v8 = vld [vmem:[%s1174_s22 + $0x70] sm:$0xff]  ;;  %v382_v9 = vpack.c.bf16 %v366_v7, %v365_v6  ;;  %v350_v10 = vld [vmem:[%s1174_s22 + $0x78] sm:$0xff]  ;;  %v364_v12 = vld [vmem:[%s1174_s22 + $0xe8] sm:$0xff]  ;;  %p992_p13 = pneg %p991_p12  ;;  %s993_s29 = sshll.u32 %s1052_s28, 4  ;;  %s994_s29 = int_to_ptr.vmem [resolvable:$false] %s993_s29 }
  0x18   : > { %v374_v13 = vpack.c.bf16 %v350_v10, %v349_v8  ;;  %v381_v14 = vpack.c.bf16 %v364_v12, %v363_v11  ;;  %v347_v16 = vld [vmem:[%s1174_s22 + $0x60] sm:$0xff]  ;;  %v348_v17 = vld [vmem:[%s1174_s22 + $0x68] sm:$0xff]  ;;  %v361_v22 = vld [vmem:[%s1174_s22 + $0xd0] sm:$0xff]  ;;  %s995_s14 = scalar_lea.vmem %s994_s29, 512  ;;  %p996_p0 = scmp.lt.s32.totalorder %s1292_s24, %s994_s29 }
  0x19   : > { %408 = vperm.xlu0 %981, %v390_v4   ;;  %933 = vmatprep.subr.msk.bf16.mxu0 %vm421_vm0, %v382_v9  ;;  %v373_v20 = vpack.c.bf16 %v348_v17, %v347_v16  ;;  %v362_v23 = vld [vmem:[%s1174_s22 + $0xd8] sm:$0xff]  ;;  %v657_v25 = vld [vmem:[%s1337_s6 + $0x10] sm:$0xff]  ;;  %v655_v32 = vld [vmem:[%s1337_s6] sm:$0xff]  ;;  %p997_p1 = scmp.lt.s32.totalorder %s995_s14, %s989_s27 }
  0x1a   : > { %398 = vperm.xlu1 %982, %v388_v5   ;;  %v450_v19 = vsel %vm421_vm0, %v374_v13, 0  ;;  %v658_v26 = vld [vmem:[%s1337_s6 + $0x18] sm:$0xff]  ;;  %v380_v28 = vpack.c.bf16 %v362_v23, %v361_v22  ;;  %v345_v29 = vld [vmem:[%s1174_s22 + $0x50] sm:$0xff]  ;;  %v359_v33 = vld [vmem:[%s1174_s22 + $0xc0] sm:$0xff] }
  0x1b   : > { %914 = vmatpush3.bf16.xpose.msra.mxu0 %v450_v19  ;;  %v447_v27 = vsel %vm421_vm0, %v373_v20, 0  ;;  %v346_v30 = vld [vmem:[%s1174_s22 + $0x58] sm:$0xff]  ;;  %v360_v34 = vld [vmem:[%s1174_s22 + $0xc8] sm:$0xff]  ;;  %v761_v38 = vld [vmem:[%s1339_s8] sm:$0xff]  ;;  %p998_p2 = por %p997_p1, %p996_p0 }
  0x1c   : > { %934 = vmatprep.subr.msk.bf16.mxu0 %vm421_vm0, %v381_v14  ;;  %v372_v31 = vpack.c.bf16 %v346_v30, %v345_v29  ;;  %v656_v35 = vld [vmem:[%s1337_s6 + $0x8] sm:$0xff]  ;;  %v379_v37 = vpack.c.bf16 %v360_v34, %v359_v33  ;;  %v343_v39 = vld [vmem:[%s1174_s22 + $0x40] sm:$0xff]  ;;  %v357_v42 = vld [vmem:[%s1174_s22 + $0xb0] sm:$0xff] }
  0x1d   : > { %561 = vperm.xlu0 %981, %v547_v15   ;;  %v344_v40 = vld [vmem:[%s1174_s22 + $0x48] sm:$0xff]  ;;  %v358_v43 = vld [vmem:[%s1174_s22 + $0xb8] sm:$0xff]  ;;  %v341_v46 = vld [vmem:[%s1174_s22 + $0x30] sm:$0xff]  ;;  %p999_p3 = pnand %p998_p2, %p992_p13 }
  0x1e   : > { %566 = vperm.xlu1 %982, %v548_v18   ;;  %v444_v36 = vsel %vm421_vm0, %v372_v31, 0  ;;  %v371_v41 = vpack.c.bf16 %v344_v40, %v343_v39  ;;  %v378_v45 = vpack.c.bf16 %v358_v43, %v357_v42  ;;  %v342_v47 = vld [vmem:[%s1174_s22 + $0x38] sm:$0xff]  ;;  %v355_v49 = vld [vmem:[%s1174_s22 + $0xa0] sm:$0xff]  ;;  %v356_v50 = vld [vmem:[%s1174_s22 + $0xa8] sm:$0xff] }
  0x1f   : > { %v370_v48 = vpack.c.bf16 %v342_v47, %v341_v46  ;;  %v377_v52 = vpack.c.bf16 %v356_v50, %v355_v49  ;;  %v339_v53 = vld [vmem:[%s1174_s22 + $0x20] sm:$0xff]  ;;  %v340_v54 = vld [vmem:[%s1174_s22 + $0x28] sm:$0xff]  ;;  %v353_v56 = vld [vmem:[%s1174_s22 + $0x90] sm:$0xff] }
  0x20   : > { %v441_v44 = vsel %vm421_vm0, %v371_v41, 0  ;;  %v369_v55 = vpack.c.bf16 %v340_v54, %v339_v53  ;;  %v354_v57 = vld [vmem:[%s1174_s22 + $0x98] sm:$0xff]  ;;  %v337_v60 = vld [vmem:[%s1174_s22 + $0x10] sm:$0xff]  ;;  %v351_v63 = vld [vmem:[%s1174_s22 + $0x80] sm:$0xff] }
  0x21   : > { %551 = vperm.xlu0 %981, %v545_v21   ;;  %v438_v51 = vsel %vm421_vm0, %v370_v48, 0  ;;  %v376_v59 = vpack.c.bf16 %v354_v57, %v353_v56  ;;  %v338_v61 = vld [vmem:[%s1174_s22 + $0x18] sm:$0xff]  ;;  %v352_v1 = vld [vmem:[%s1174_s22 + $0x88] sm:$0xff]  ;;  %v335_v5 = vld [vmem:[%s1174_s22] sm:$0xff] }
  0x22   : > { %556 = vperm.xlu1 %982, %v546_v24   ;;  %v435_v58 = vsel %vm421_vm0, %v369_v55, 0  ;;  %v368_v62 = vpack.c.bf16 %v338_v61, %v337_v60  ;;  %v375_v4 = vpack.c.bf16 %v352_v1, %v351_v63  ;;  %v336_v6 = vld [vmem:[%s1174_s22 + $0x8] sm:$0xff]  ;;  %v985_v41 = vld [vmem:[%s1334_s3] sm:$0xff]   ;;  %s912_s22 = sshll.u32 %s1124_s13, 8  ;;  %s814_s13 = scalar_lea.sflag [#allocation3], %s324_s16 }
  0x23   : > { %916 = vmatpush3.bf16.xpose.msra.mxu0 %v447_v27  ;;  %v367_v7 = vpack.c.bf16 %v336_v6, %v335_v5  ;;  %v984_v9 = vld [vmem:[%s1332_s1 + $0x8] sm:$0xff]   ;;  %s1290_s26 = scalar_lea.hbm %s1340_s9, %s912_s22 }
  0x24   : > { %935 = vmatprep.subr.msk.bf16.mxu0 %vm421_vm0, %v380_v28  ;;  %v432_v3 = vsel %vm421_vm0, %v368_v62, 0  ;;  %v986_v42 = vld [vmem:[%s1334_s3 + $0x8] sm:$0xff]  }
  0x25   : > { %671 = vperm.xlu0 %981, %v657_v25   ;;  %v429_v8 = vsel %vm421_vm0, %v367_v7, 0 }
  0x26   : > { %676 = vperm.xlu1 %982, %v658_v26  }
  0x29   : > { %661 = vperm.xlu0 %981, %v655_v32  }
  0x2a   : > { %666 = vperm.xlu1 %982, %v656_v35  }
  0x2b   : > { %918 = vmatpush3.bf16.xpose.msra.mxu0 %v444_v36 }
  0x2c   : > { %936 = vmatprep.subr.msk.bf16.mxu0 %vm421_vm0, %v379_v37 }
  0x2d   : > { %764 = vperm.xlu0 %981, %v761_v38  }
  0x33   : > { %920 = vmatpush3.bf16.xpose.msra.mxu0 %v441_v44 }
  0x34   : > { %937 = vmatprep.subr.msk.bf16.mxu0 %vm421_vm0, %v378_v45 }
  0x3b   : > { %922 = vmatpush3.bf16.xpose.msra.mxu0 %v438_v51 }
  0x3c   : > { %938 = vmatprep.subr.msk.bf16.mxu0 %vm421_vm0, %v377_v52 }
  0x43   : > { %924 = vmatpush3.bf16.xpose.msra.mxu0 %v435_v58 }
  0x44   : > { %939 = vmatprep.subr.msk.bf16.mxu0 %vm421_vm0, %v376_v59 }
  0x4b   : > { %926 = vmatpush3.bf16.xpose.msra.mxu0 %v432_v3 }
  0x4c   : > { %940 = vmatprep.subr.msk.bf16.mxu0 %vm421_vm0, %v375_v4 }
  0x53   : > { %928 = vmatpush3.bf16.xpose.msra.mxu0 %v429_v8 }
  0x5a   : > { %930 = vmatmul.mubr.msk.bf16.vlgmr.msra.gmra.mxu0 %vm421_vm0, %v1155_v0 }
  0x5b   : > { %931 = vmatprep.mubr.msk.bf16.mxu0 %vm421_vm0, %v984_v9 }
  0x62   : > { %932 = vmatmul.mubr.msk.bf16.gmra.mxu0 %vm421_vm0, %v984_v9 }
  0x90   : > { %v404_v13 = vpop.permute.xlu0 %403 }
  0x91   : > { %v394_v14 = vpop.permute.xlu1 %393 }
  0x94   : > { %v409_v18 = vpop.permute.xlu0 %408 }
  0x95   : > { %v399_v19 = vpop.permute.xlu1 %398 }
  0x98   : > { %v562_v48 = vpop.permute.xlu0 %561 }
  0x99   : > { %v567_v46 = vpop.permute.xlu1 %566 }
  0x9c   : > { %v552_v56 = vpop.permute.xlu0 %551 }
  0x9d   : > { %v557_v51 = vpop.permute.xlu1 %556 }
 0x11a   : > { %v510_v10 = vpop.f32.mrf.mxu0 }
 0x11b   : > { %v511_v32 = vadd.f32 %v510_v10, %v394_v14 }
 0x11c   : > { %v512_v11 = vpop.f32.mrf.mxu0 }
 0x11d   : > { %v513_v25 = vadd.f32 %v512_v11, %v394_v14  ;;  %v529_v39 = vmax.f32 %v511_v32, 0.0  ;;  %v988_v14 = vld [vmem:[%s1336_s5 + $0x8] sm:$0xff]  }
 0x11e   : > { %v514_v12 = vpop.f32.mrf.mxu0 }
 0x11f   : > { %v515_v27 = vadd.f32 %v514_v12, %v399_v19  ;;  %v530_v34 = vmax.f32 %v513_v25, 0.0 }
 0x120   : > { %v516_v15 = vpop.f32.mrf.mxu0 }
 0x121   : > { %v517_v21 = vadd.f32 %v516_v15, %v399_v19  ;;  %v531_v36 = vmax.f32 %v515_v27, 0.0 }
 0x122   : > { %v520_v16 = vpop.f32.mrf.mxu0 }
 0x123   : > { %v521_v24 = vadd.f32 %v520_v16, %v404_v13  ;;  %v532_v29 = vmax.f32 %v517_v21, 0.0  ;;  %v537_v40 = vpack.c.bf16 %v531_v36, %v529_v39 }
 0x124   : > { %v522_v17 = vpop.f32.mrf.mxu0 }
 0x125   : > { %v523_v22 = vadd.f32 %v522_v17, %v404_v13  ;;  %v533_v33 = vmax.f32 %v521_v24, 0.0  ;;  %v538_v38 = vpack.c.bf16 %v532_v29, %v530_v34  ;;  %v987_v13 = vld [vmem:[%s1336_s5] sm:$0xff]  }
 0x126   : > { %v524_v20 = vpop.f32.mrf.mxu0 }
 0x127   : > { %v525_v23 = vadd.f32 %v524_v20, %v409_v18  ;;  %v534_v30 = vmax.f32 %v523_v22, 0.0  ;;  %v672_v20 = vpop.permute.xlu0 %671 }
 0x128   : > { %v526_v0 = vpop.f32.mrf.mxu0 }
 0x129   : > { %v527_v26 = vadd.f32 %v526_v0, %v409_v18  ;;  %v535_v28 = vmax.f32 %v525_v23, 0.0  ;;  %v677_v18 = vpop.permute.xlu1 %676 }
 0x12b   : > { %v536_v31 = vmax.f32 %v527_v26, 0.0  ;;  %v539_v37 = vpack.c.bf16 %v535_v28, %v533_v33  ;;  %v662_v27 = vpop.permute.xlu0 %661 }
 0x12d   : > { %v540_v35 = vpack.c.bf16 %v536_v31, %v534_v30  ;;  %v667_v23 = vpop.permute.xlu1 %666 }
 0x12f   : > { %598 = vmatprep.subr.bf16.mxu1 %v540_v35 }
 0x130   : > { %599 = vmatpush1.bf16.msra.mxu1 %v539_v37 }
 0x131   : > { %600 = vmatprep.subr.bf16.mxu1 %v538_v38 }
 0x134   : > { %601 = vmatpush1.bf16.msra.mxu1 %v537_v40 }
 0x137   : > { %900 = vmatmul.mubr.msk.bf16.vlgmr.msra.gmra.mxu1 %vm579_vm1, %v985_v41 }
 0x138   : > { %628 = vmatprep.mubr.bf16.mxu1 %v1051_v2 }
 0x13f   : > { %901 = vmatmul.mubr.msk.bf16.gmra.mxu1 %vm579_vm1, %v986_v42 }
 0x140   : > { %727 = vmatprep.mubr.bf16.mxu1 %v1051_v2 }
 0x1f7   : > { %v620_v43 = vpop.f32.mrf.mxu1 }
 0x1f8   : > { %v621_v4 = vadd.f32 %v620_v43, %v552_v56 }
 0x1f9   : > { %v622_v44 = vpop.f32.mrf.mxu1 }
 0x1fa   : > { %v623_v59 = vadd.f32 %v622_v44, %v552_v56  ;;  %v639_v11 = vmax.f32 %v621_v4, 0.0 }
 0x1fb   : > { %v624_v45 = vpop.f32.mrf.mxu1 }
 0x1fc   : > { %v625_v61 = vadd.f32 %v624_v45, %v557_v51  ;;  %v640_v6 = vmax.f32 %v623_v59, 0.0  ;;  %v760_v45 = vld [vmem:[%s1338_s7] sm:$0xf] }
 0x1fd   : > { %v626_v47 = vpop.f32.mrf.mxu1 }
 0x1fe   : > { %v627_v53 = vadd.f32 %v626_v47, %v557_v51  ;;  %v641_v8 = vmax.f32 %v625_v61, 0.0 }
 0x1ff   : > { %v630_v49 = vpop.f32.mrf.mxu1 }
 0x200   : > { %v631_v57 = vadd.f32 %v630_v49, %v562_v48  ;;  %v642_v63 = vmax.f32 %v627_v53, 0.0  ;;  %v647_v12 = vpack.c.bf16 %v641_v8, %v639_v11 }
 0x201   : > { %v632_v50 = vpop.f32.mrf.mxu1 }
 0x202   : > { %v633_v54 = vadd.f32 %v632_v50, %v562_v48  ;;  %v643_v5 = vmax.f32 %v631_v57, 0.0  ;;  %v648_v10 = vpack.c.bf16 %v642_v63, %v640_v6 }
 0x203   : > { %v634_v52 = vpop.f32.mrf.mxu1 }
 0x204   : > { %v635_v55 = vadd.f32 %v634_v52, %v567_v46  ;;  %v644_v1 = vmax.f32 %v633_v54, 0.0 }
 0x205   : > { %v636_v58 = vpop.f32.mrf.mxu1 }
 0x206   : > { %v637_v60 = vadd.f32 %v636_v58, %v567_v46  ;;  %v645_v62 = vmax.f32 %v635_v55, 0.0  ;;  %v765_v46 = vpop.permute.xlu0 %764 }
 0x208   : > { %v646_v3 = vmax.f32 %v637_v60, 0.0  ;;  %v649_v9 = vpack.c.bf16 %v645_v62, %v643_v5 }
 0x20a   : > { %v650_v7 = vpack.c.bf16 %v646_v3, %v644_v1 }
 0x20c   : > { %707 = vmatprep.subr.bf16.mxu1 %v650_v7 }
 0x20d   : > { %708 = vmatpush1.bf16.msra.mxu1 %v649_v9 }
 0x20e   : > { %709 = vmatprep.subr.bf16.mxu1 %v648_v10 }
 0x211   : > { %710 = vmatpush1.bf16.msra.mxu1 %v647_v12 }
 0x214   : > { %904 = vmatmul.mubr.msk.bf16.vlgmr.msra.gmra.mxu1 %vm579_vm1, %v987_v13 }
 0x215   : > { %737 = vmatprep.mubr.bf16.mxu1 %v1051_v2 }
 0x21c   : > { %905 = vmatmul.mubr.msk.bf16.gmra.mxu1 %vm579_vm1, %v988_v14 }
 0x21d   : > { %802 = vmatprep.mubr.bf16.mxu1 %v1051_v2 }
 0x2d4   : > { %v729_v15 = vpop.f32.mrf.mxu1 }
 0x2d5   : > { %v730_v36 = vadd.f32 %v729_v15, %v662_v27 }
 0x2d6   : > { %v731_v16 = vpop.f32.mrf.mxu1 }
 0x2d7   : > { %v732_v30 = vadd.f32 %v731_v16, %v662_v27  ;;  %v748_v43 = vmax.f32 %v730_v36, 0.0 }
 0x2d8   : > { %v733_v17 = vpop.f32.mrf.mxu1 }
 0x2d9   : > { %v734_v32 = vadd.f32 %v733_v17, %v667_v23  ;;  %v749_v38 = vmax.f32 %v732_v30, 0.0 }
 0x2da   : > { %v735_v19 = vpop.f32.mrf.mxu1 }
 0x2db   : > { %v736_v0 = vadd.f32 %v735_v19, %v667_v23  ;;  %v750_v40 = vmax.f32 %v734_v32, 0.0 }
 0x2dc   : > { %v739_v21 = vpop.f32.mrf.mxu1 }
 0x2dd   : > { %v740_v28 = vadd.f32 %v739_v21, %v672_v20  ;;  %v751_v33 = vmax.f32 %v736_v0, 0.0  ;;  %v756_v44 = vpack.c.bf16 %v750_v40, %v748_v43 }
 0x2de   : > { %v741_v22 = vpop.f32.mrf.mxu1 }
 0x2df   : > { %v742_v25 = vadd.f32 %v741_v22, %v672_v20  ;;  %v752_v37 = vmax.f32 %v740_v28, 0.0  ;;  %v757_v42 = vpack.c.bf16 %v751_v33, %v749_v38 }
 0x2e0   : > { %v743_v24 = vpop.f32.mrf.mxu1 }
 0x2e1   : > { %v744_v26 = vadd.f32 %v743_v24, %v677_v18  ;;  %v753_v34 = vmax.f32 %v742_v25, 0.0 }
 0x2e2   : > { %v745_v29 = vpop.f32.mrf.mxu1 }
 0x2e3   : > { %v746_v31 = vadd.f32 %v745_v29, %v677_v18  ;;  %v754_v2 = vmax.f32 %v744_v26, 0.0 }
 0x2e5   : > { %v755_v35 = vmax.f32 %v746_v31, 0.0  ;;  %v758_v41 = vpack.c.bf16 %v754_v2, %v752_v37 }
 0x2e7   : > { %v759_v39 = vpack.c.bf16 %v755_v35, %v753_v34 }
 0x2e9   : > { %782 = vmatprep.subr.bf16.mxu1 %v759_v39 }
 0x2ea   : > { %783 = vmatpush1.bf16.msra.mxu1 %v758_v41 }
 0x2eb   : > { %784 = vmatprep.subr.bf16.mxu1 %v757_v42 }
 0x2ee   : > { %785 = vmatpush1.bf16.msra.mxu1 %v756_v44 }
 0x2f1   : > { %906 = vmatmul.mubr.msk.bf16.vlgmr.msra.gmra.mxu1 %vm579_vm1, %v760_v45 }
 0x3b1   : > { %v804_v47 = vpop.f32.mrf.mxu1 }
 0x3b2   : > { %v805_v48 = vadd.f32 %v804_v47, %v765_v46 }
 0x3b3   : > { %v806_v49 = vpop.f32.mrf.mxu1 }
 0x3b4   : > { %811 = vst [vmem:[%s326_s23] sm:$0xff] %v805_v48  ;;  %v807_v50 = vadd.f32 %v806_v49, %v765_v46 }
 0x3b5   : > { %v808_v51 = vpop.f32.mrf.mxu1 }
 0x3b6   : > { %812 = vst [vmem:[%s326_s23 + $0x8] sm:$0xff] %v807_v50 }
 0x3b7   : > { %v809_v52 = vpop.f32.mrf.mxu1 }
 0x3b8   : > { %1002 = shalt.err (!%p999_p3)
}
 0x3b9   : > { %s1003_s17 = scalar_lea.hbm %s1290_s26, 256  ;;  %s1007_s23 = scalar_lea.hbm %s1340_s9, 512 }
 0x3ba   : > { %p1004_p4 = scmp.ne.s32.totalorder %s1290_s26, %s1003_s17  ;;  %p1008_p9 = scmp.lt.s32.totalorder %s1290_s26, %s1340_s9 }
 0x3bb   : > { %p1009_p10 = scmp.lt.s32.totalorder %s1007_s23, %s1003_s17 }
 0x3bc   : > { %p1005_p7 = pnand %p1004_p4, %p1141_p5 }
 0x3bd   : > { %p1010_p11 = por %p1009_p10, %p1008_p9 }
 0x3be   : > { %p1006_p8 = pneg %p1005_p7 }
 0x3c0   : > { %p1011_p12 = pnand %p1010_p11, %p1006_p8 }
 0x3c2   : > { %1014 = shalt.err (!%p1011_p12)
}
 0x3c3   : > { %941 = dma.vmem_to_hbm [thread:$0]  (%p1141_p5), %s1292_s24, 256, %s1290_s26, %s814_s13  }
 0x3c4 PF: > { %p947_p13 = scmp.ge.s32.totalorder %s1049_s12, 2  ;;  %s840_s27 = sand.u32 1, %s1037_s30  }
 0x3c5   : > { %s841_s28 = scalar_lea.sflag [#allocation3], %s840_s27 }
 0x3c6   : > { %p944_p0 = pnand %p947_p13, %p1145_p6 }
 0x3c8   : > { %p945_p1 = pneg %p944_p0 }
 0x3ca   : > { %1032 = dma.done.wait (%p945_p1), %s841_s28, 256  }
 0x3cb   : > { %1034 = vsyncadd (%p945_p1), %s841_s28, 4294967040  ;;  %p19_p2 = scmp.ge.s32.totalorder %s1128_s15, 4   ;;  %s1343_s30 = smov %s1041_s10 }
 0x3cc   : > { %s1344_s10 = smov %s1045_s11  ;;  %s1345_s11 = smov %s1139_s18 }
 0x3cd   : > { %s1346_s12 = smov %s1128_s15  ;;  %21 = sbr.rel (!%p19_p2) target bundleno = 3 (0x3), region = 91 }
 0x3d2   :  { %846 = vsyncpa [#allocation3], 1 }
 0x3d3   :  { %848 = vsyncpa [#allocation3 + $0x1], 1 }

</bundles_post_ra>
